<compile_context>
chip_gen: v5e
topology: v5e:2x2
jax: 0.10.0
libtpu: 0.0.40
codegen_flags: <defaults>
</compile_context>

<pallas_src>
import jax
import jax.numpy as jnp
from jax.experimental import pallas as pl
from jax.experimental.pallas import tpu as pltpu

LATENT_DIMS = 128
SPEED_HIDDENS = [8, 16]
ACTION_HIDDENS = [8, 16]
HIDDENS = [64, 64]
ACTION_DIM = 2
A_IN = LATENT_DIMS + SPEED_HIDDENS[-1] + ACTION_HIDDENS[-1]  # 160


def _round_up(x, m):
    return ((x + m - 1) // m) * m


def dueling_kernel(img_ref, speed_ref, act_ref,
                   ws1_ref, bs1_ref, ws2_ref, bs2_ref,
                   wa1_ref, ba1_ref, wa2_ref, ba2_ref,
                   w1_img_ref, w1_spd_ref, w1_act_ref, b1_ref,
                   w2_ref, b2_ref, w3_ref, b3_ref,
                   out_ref):
    img = img_ref[...]        # (TILE_B, 128)
    speed = speed_ref[...]    # (TILE_B, 1)
    act = act_ref[...]        # (TILE_B, 2)

    # ---- speed encoder: Linear(1,8) as a VPU outer-product broadcast -> ReLU -> Linear(8,16)
    hs = jnp.maximum(speed * ws1_ref[...] + bs1_ref[...], 0.0)            # (TILE_B, 8)
    spd_emb = jnp.dot(hs, ws2_ref[...],
                      preferred_element_type=jnp.float32) + bs2_ref[...]  # (TILE_B, 16)

    # ---- action encoder: Linear(2,8) as two VPU broadcast mul-adds -> ReLU -> Linear(8,16)
    wa1 = wa1_ref[...]                                                    # (2, 8)
    ha = (act[:, 0:1] * wa1[0:1, :]
          + act[:, 1:2] * wa1[1:2, :]
          + ba1_ref[...])
    ha = jnp.maximum(ha, 0.0)                                             # (TILE_B, 8)
    act_emb = jnp.dot(ha, wa2_ref[...],
                      preferred_element_type=jnp.float32) + ba2_ref[...]  # (TILE_B, 16)

    # ---- A_network layer 1: concat([img, spd_emb, act_emb]) @ W1 + b1  (split matmul,
    # identical math, avoids an in-kernel lane concat; img term is a clean K=128 pass)
    z1 = (jnp.dot(img, w1_img_ref[...], preferred_element_type=jnp.float32)
          + jnp.dot(spd_emb, w1_spd_ref[...], preferred_element_type=jnp.float32)
          + jnp.dot(act_emb, w1_act_ref[...], preferred_element_type=jnp.float32)
          + b1_ref[...])
    h1 = jnp.maximum(z1, 0.0)                                             # (TILE_B, 64)

    # ---- A_network layer 2: Linear(64,64) -> ReLU
    h2 = jnp.maximum(
        jnp.dot(h1, w2_ref[...], preferred_element_type=jnp.float32) + b2_ref[...], 0.0)

    # ---- A_network layer 3: Linear(64,1)
    out_ref[...] = jnp.dot(h2, w3_ref[...],
                           preferred_element_type=jnp.float32) + b3_ref[...]

    # Note: the V-stream (V_network + Q = V + A) is commented out in the PyTorch
    # source, so the executed forward is advantage-only; `advantage_only` is a no-op.


def _linear_init(key, fan_in, fan_out):
    # PyTorch nn.Linear default: U(-1/sqrt(fan_in), 1/sqrt(fan_in)); weights stored as (in, out).
    kw, kb = jax.random.split(key)
    bound = 1.0 / jnp.sqrt(jnp.float32(fan_in))
    w = jax.random.uniform(kw, (fan_in, fan_out), jnp.float32, -bound, bound)
    b = jax.random.uniform(kb, (1, fan_out), jnp.float32, -bound, bound)
    return w, b


def init_params(key):
    keys = jax.random.split(key, 7)
    ws1, bs1 = _linear_init(keys[0], 1, SPEED_HIDDENS[0])
    ws2, bs2 = _linear_init(keys[1], SPEED_HIDDENS[0], SPEED_HIDDENS[1])
    wa1, ba1 = _linear_init(keys[2], ACTION_DIM, ACTION_HIDDENS[0])
    wa2, ba2 = _linear_init(keys[3], ACTION_HIDDENS[0], ACTION_HIDDENS[1])
    w1, b1 = _linear_init(keys[4], A_IN, HIDDENS[0])
    w2, b2 = _linear_init(keys[5], HIDDENS[0], HIDDENS[1])
    w3, b3 = _linear_init(keys[6], HIDDENS[1], 1)
    return dict(ws1=ws1, bs1=bs1, ws2=ws2, bs2=bs2,
                wa1=wa1, ba1=ba1, wa2=wa2, ba2=ba2,
                w1=w1, b1=b1, w2=w2, b2=b2, w3=w3, b3=b3)


def dueling_forward(params, obs_feat, action, *, tile_b=2048):
    bs = obs_feat.shape[0]

    # Split img / speed outside the kernel (free XLA slice, lane-aligned DMA inputs).
    img = obs_feat[:, :LATENT_DIMS]
    speed = obs_feat[:, LATENT_DIMS:]

    # Batch tile: multiple of 8 (sublane), capped so small batches stay one tile.
    tile_b = min(tile_b, _round_up(bs, 8))
    padded = _round_up(bs, tile_b)
    if padded != bs:
        pad = padded - bs
        img = jnp.pad(img, ((0, pad), (0, 0)))
        speed = jnp.pad(speed, ((0, pad), (0, 0)))
        action = jnp.pad(action, ((0, pad), (0, 0)))

    # Split W1 along the concat boundaries (host-side, one-time).
    w1 = params["w1"]
    w1_img = w1[:LATENT_DIMS]                                          # (128, 64)
    w1_spd = w1[LATENT_DIMS:LATENT_DIMS + SPEED_HIDDENS[-1]]           # (16, 64)
    w1_act = w1[LATENT_DIMS + SPEED_HIDDENS[-1]:]                      # (16, 64)

    inputs = (img, speed, action,
              params["ws1"], params["bs1"], params["ws2"], params["bs2"],
              params["wa1"], params["ba1"], params["wa2"], params["ba2"],
              w1_img, w1_spd, w1_act, params["b1"],
              params["w2"], params["b2"], params["w3"], params["b3"])

    def batch_spec(ncols):
        return pl.BlockSpec((tile_b, ncols), lambda i: (i, 0))

    def const_spec(arr):
        return pl.BlockSpec(arr.shape, lambda i: (0, 0))

    in_specs = ([batch_spec(LATENT_DIMS), batch_spec(1), batch_spec(ACTION_DIM)]
                + [const_spec(a) for a in inputs[3:]])

    out = pl.pallas_call(
        dueling_kernel,
        out_shape=jax.ShapeDtypeStruct((padded, 1), jnp.float32),
        grid=(padded // tile_b,),
        in_specs=in_specs,
        out_specs=pl.BlockSpec((tile_b, 1), lambda i: (i, 0)),
        compiler_params=pltpu.CompilerParams(
            dimension_semantics=("parallel",)),
    )(*inputs)

    return out[:bs, 0]   # matches torch .view(-1)


def dueling_reference(params, obs_feat, action):
    hi = jax.lax.Precision.HIGHEST
    img = obs_feat[:, :LATENT_DIMS]
    speed = obs_feat[:, LATENT_DIMS:]
    hs = jnp.maximum(jnp.dot(speed, params["ws1"], precision=hi) + params["bs1"], 0.0)
    spd = jnp.dot(hs, params["ws2"], precision=hi) + params["bs2"]
    ha = jnp.maximum(jnp.dot(action, params["wa1"], precision=hi) + params["ba1"], 0.0)
    aemb = jnp.dot(ha, params["wa2"], precision=hi) + params["ba2"]
    cat = jnp.concatenate([img, spd, aemb], axis=1)
    h1 = jnp.maximum(jnp.dot(cat, params["w1"], precision=hi) + params["b1"], 0.0)
    h2 = jnp.maximum(jnp.dot(h1, params["w2"], precision=hi) + params["b2"], 0.0)
    return (jnp.dot(h2, params["w3"], precision=hi) + params["b3"]).reshape(-1)


if __name__ == "__main__":
    key = jax.random.PRNGKey(0)
    k_params, k_obs, k_act, k_obs2, k_act2 = jax.random.split(key, 5)

    params = init_params(k_params)

    # Small test 1: batch = 8 (single tile, exact fit).
    bs = 8
    obs_feat = jax.random.normal(k_obs, (bs, LATENT_DIMS + 1), jnp.float32)
    action = jax.random.normal(k_act, (bs, ACTION_DIM), jnp.float32)
    out = jax.block_until_ready(dueling_forward(params, obs_feat, action))
    ref = dueling_reference(params, obs_feat, action)
    assert out.shape == (bs,), out.shape
    assert jnp.allclose(out, ref, atol=1e-4, rtol=1e-4), (out, ref)

    # Small test 2: batch = 13 (exercises padding to a multiple-of-8 tile).
    bs2 = 13
    obs_feat2 = jax.random.normal(k_obs2, (bs2, LATENT_DIMS + 1), jnp.float32)
    action2 = jax.random.normal(k_act2, (bs2, ACTION_DIM), jnp.float32)
    out2 = jax.block_until_ready(dueling_forward(params, obs_feat2, action2))
    ref2 = dueling_reference(params, obs_feat2, action2)
    assert out2.shape == (bs2,), out2.shape
    assert jnp.allclose(out2, ref2, atol=1e-4, rtol=1e-4), (out2, ref2)

    print("KERNEL_OK")
</pallas_src>

<mosaic_0001>
module attributes {stable_mosaic.version = 11 : i64} {
  func.func @dueling_kernel(%arg0: i32, %arg1: memref<8x128xf32, #tpu.memory_space<vmem>>, %arg2: memref<8x1xf32, #tpu.memory_space<vmem>>, %arg3: memref<8x2xf32, #tpu.memory_space<vmem>>, %arg4: memref<1x8xf32, #tpu.memory_space<vmem>>, %arg5: memref<1x8xf32, #tpu.memory_space<vmem>>, %arg6: memref<8x16xf32, #tpu.memory_space<vmem>>, %arg7: memref<1x16xf32, #tpu.memory_space<vmem>>, %arg8: memref<2x8xf32, #tpu.memory_space<vmem>>, %arg9: memref<1x8xf32, #tpu.memory_space<vmem>>, %arg10: memref<8x16xf32, #tpu.memory_space<vmem>>, %arg11: memref<1x16xf32, #tpu.memory_space<vmem>>, %arg12: memref<128x64xf32, #tpu.memory_space<vmem>>, %arg13: memref<16x64xf32, #tpu.memory_space<vmem>>, %arg14: memref<16x64xf32, #tpu.memory_space<vmem>>, %arg15: memref<1x64xf32, #tpu.memory_space<vmem>>, %arg16: memref<64x64xf32, #tpu.memory_space<vmem>>, %arg17: memref<1x64xf32, #tpu.memory_space<vmem>>, %arg18: memref<64x1xf32, #tpu.memory_space<vmem>>, %arg19: memref<1x1xf32, #tpu.memory_space<vmem>>, %arg20: memref<8x1xf32, #tpu.memory_space<vmem>>) attributes {dimension_semantics = [#tpu.dimension_semantics<parallel>], iteration_bounds = array<i64: 1>, scalar_prefetch = 0 : i64, scratch_operands = 0 : i64, tpu.core_type = #tpu.core_type<tc>, window_params = [{transform_indices = @transform_0, window_bounds = array<i64: 8, 128>}, {transform_indices = @transform_1, window_bounds = array<i64: 8, 1>}, {transform_indices = @transform_2, window_bounds = array<i64: 8, 2>}, {pipeline_mode = #tpu.pipeline_mode<synchronous>, transform_indices = @transform_3, window_bounds = array<i64: 1, 8>}, {pipeline_mode = #tpu.pipeline_mode<synchronous>, transform_indices = @transform_4, window_bounds = array<i64: 1, 8>}, {pipeline_mode = #tpu.pipeline_mode<synchronous>, transform_indices = @transform_5, window_bounds = array<i64: 8, 16>}, {pipeline_mode = #tpu.pipeline_mode<synchronous>, transform_indices = @transform_6, window_bounds = array<i64: 1, 16>}, {pipeline_mode = #tpu.pipeline_mode<synchronous>, transform_indices = @transform_7, window_bounds = array<i64: 2, 8>}, {pipeline_mode = #tpu.pipeline_mode<synchronous>, transform_indices = @transform_8, window_bounds = array<i64: 1, 8>}, {pipeline_mode = #tpu.pipeline_mode<synchronous>, transform_indices = @transform_9, window_bounds = array<i64: 8, 16>}, {pipeline_mode = #tpu.pipeline_mode<synchronous>, transform_indices = @transform_10, window_bounds = array<i64: 1, 16>}, {pipeline_mode = #tpu.pipeline_mode<synchronous>, transform_indices = @transform_11, window_bounds = array<i64: 128, 64>}, {pipeline_mode = #tpu.pipeline_mode<synchronous>, transform_indices = @transform_12, window_bounds = array<i64: 16, 64>}, {pipeline_mode = #tpu.pipeline_mode<synchronous>, transform_indices = @transform_13, window_bounds = array<i64: 16, 64>}, {pipeline_mode = #tpu.pipeline_mode<synchronous>, transform_indices = @transform_14, window_bounds = array<i64: 1, 64>}, {pipeline_mode = #tpu.pipeline_mode<synchronous>, transform_indices = @transform_15, window_bounds = array<i64: 64, 64>}, {pipeline_mode = #tpu.pipeline_mode<synchronous>, transform_indices = @transform_16, window_bounds = array<i64: 1, 64>}, {pipeline_mode = #tpu.pipeline_mode<synchronous>, transform_indices = @transform_17, window_bounds = array<i64: 64, 1>}, {pipeline_mode = #tpu.pipeline_mode<synchronous>, transform_indices = @transform_18, window_bounds = array<i64: 1, 1>}, {transform_indices = @transform_19, window_bounds = array<i64: 8, 1>}]} {
    %c0 = arith.constant 0 : index
    %c0_0 = arith.constant 0 : index
    %0 = vector.load %arg1[%c0, %c0_0] : memref<8x128xf32, #tpu.memory_space<vmem>>, vector<8x128xf32>
    %c0_1 = arith.constant 0 : index
    %c0_2 = arith.constant 0 : index
    %1 = vector.load %arg2[%c0_1, %c0_2] : memref<8x1xf32, #tpu.memory_space<vmem>>, vector<8x1xf32>
    %c0_3 = arith.constant 0 : index
    %c0_4 = arith.constant 0 : index
    %2 = vector.load %arg3[%c0_3, %c0_4] : memref<8x2xf32, #tpu.memory_space<vmem>>, vector<8x2xf32>
    %c0_5 = arith.constant 0 : index
    %c0_6 = arith.constant 0 : index
    %3 = vector.load %arg4[%c0_5, %c0_6] : memref<1x8xf32, #tpu.memory_space<vmem>>, vector<1x8xf32>
    %4 = vector.broadcast %1 : vector<8x1xf32> to vector<8x8xf32>
    %5 = vector.broadcast %3 : vector<1x8xf32> to vector<8x8xf32>
    %6 = arith.mulf %4, %5 : vector<8x8xf32>
    %c0_7 = arith.constant 0 : index
    %c0_8 = arith.constant 0 : index
    %7 = vector.load %arg5[%c0_7, %c0_8] : memref<1x8xf32, #tpu.memory_space<vmem>>, vector<1x8xf32>
    %8 = vector.broadcast %7 : vector<1x8xf32> to vector<8x8xf32>
    %9 = arith.addf %6, %8 : vector<8x8xf32>
    %cst = arith.constant 0.000000e+00 : f32
    %10 = vector.broadcast %cst : f32 to vector<8x8xf32>
    %11 = arith.maximumf %9, %10 : vector<8x8xf32>
    %c0_9 = arith.constant 0 : index
    %c0_10 = arith.constant 0 : index
    %12 = vector.load %arg6[%c0_9, %c0_10] : memref<8x16xf32, #tpu.memory_space<vmem>>, vector<8x16xf32>
    %cst_11 = arith.constant dense<0.000000e+00> : vector<8x16xf32>
    %13 = tpu.matmul %11, %12, %cst_11 {dimension_numbers = #tpu.dot_dimension_numbers<[1], [0], [0], [1], [0, 0, 1, 1], [], []>} : vector<8x8xf32>, vector<8x16xf32>, vector<8x16xf32> -> vector<8x16xf32>
    %c0_12 = arith.constant 0 : index
    %c0_13 = arith.constant 0 : index
    %14 = vector.load %arg7[%c0_12, %c0_13] : memref<1x16xf32, #tpu.memory_space<vmem>>, vector<1x16xf32>
    %15 = vector.broadcast %14 : vector<1x16xf32> to vector<8x16xf32>
    %16 = arith.addf %13, %15 : vector<8x16xf32>
    %c0_14 = arith.constant 0 : index
    %c0_15 = arith.constant 0 : index
    %17 = vector.load %arg8[%c0_14, %c0_15] : memref<2x8xf32, #tpu.memory_space<vmem>>, vector<2x8xf32>
    %18 = vector.extract_strided_slice %2 {offsets = [0, 0], sizes = [8, 1], strides = [1, 1]} : vector<8x2xf32> to vector<8x1xf32>
    %19 = vector.extract_strided_slice %17 {offsets = [0, 0], sizes = [1, 8], strides = [1, 1]} : vector<2x8xf32> to vector<1x8xf32>
    %20 = vector.broadcast %18 : vector<8x1xf32> to vector<8x8xf32>
    %21 = vector.broadcast %19 : vector<1x8xf32> to vector<8x8xf32>
    %22 = arith.mulf %20, %21 : vector<8x8xf32>
    %23 = vector.extract_strided_slice %2 {offsets = [0, 1], sizes = [8, 1], strides = [1, 1]} : vector<8x2xf32> to vector<8x1xf32>
    %24 = vector.extract_strided_slice %17 {offsets = [1, 0], sizes = [1, 8], strides = [1, 1]} : vector<2x8xf32> to vector<1x8xf32>
    %25 = vector.broadcast %23 : vector<8x1xf32> to vector<8x8xf32>
    %26 = vector.broadcast %24 : vector<1x8xf32> to vector<8x8xf32>
    %27 = arith.mulf %25, %26 : vector<8x8xf32>
    %28 = arith.addf %22, %27 : vector<8x8xf32>
    %c0_16 = arith.constant 0 : index
    %c0_17 = arith.constant 0 : index
    %29 = vector.load %arg9[%c0_16, %c0_17] : memref<1x8xf32, #tpu.memory_space<vmem>>, vector<1x8xf32>
    %30 = vector.broadcast %29 : vector<1x8xf32> to vector<8x8xf32>
    %31 = arith.addf %28, %30 : vector<8x8xf32>
    %cst_18 = arith.constant 0.000000e+00 : f32
    %32 = vector.broadcast %cst_18 : f32 to vector<8x8xf32>
    %33 = arith.maximumf %31, %32 : vector<8x8xf32>
    %c0_19 = arith.constant 0 : index
    %c0_20 = arith.constant 0 : index
    %34 = vector.load %arg10[%c0_19, %c0_20] : memref<8x16xf32, #tpu.memory_space<vmem>>, vector<8x16xf32>
    %cst_21 = arith.constant dense<0.000000e+00> : vector<8x16xf32>
    %35 = tpu.matmul %33, %34, %cst_21 {dimension_numbers = #tpu.dot_dimension_numbers<[1], [0], [0], [1], [0, 0, 1, 1], [], []>} : vector<8x8xf32>, vector<8x16xf32>, vector<8x16xf32> -> vector<8x16xf32>
    %c0_22 = arith.constant 0 : index
    %c0_23 = arith.constant 0 : index
    %36 = vector.load %arg11[%c0_22, %c0_23] : memref<1x16xf32, #tpu.memory_space<vmem>>, vector<1x16xf32>
    %37 = vector.broadcast %36 : vector<1x16xf32> to vector<8x16xf32>
    %38 = arith.addf %35, %37 : vector<8x16xf32>
    %c0_24 = arith.constant 0 : index
    %c0_25 = arith.constant 0 : index
    %39 = vector.load %arg12[%c0_24, %c0_25] : memref<128x64xf32, #tpu.memory_space<vmem>>, vector<128x64xf32>
    %cst_26 = arith.constant dense<0.000000e+00> : vector<8x64xf32>
    %40 = tpu.matmul %0, %39, %cst_26 {dimension_numbers = #tpu.dot_dimension_numbers<[1], [0], [0], [1], [0, 0, 1, 1], [], []>} : vector<8x128xf32>, vector<128x64xf32>, vector<8x64xf32> -> vector<8x64xf32>
    %c0_27 = arith.constant 0 : index
    %c0_28 = arith.constant 0 : index
    %41 = vector.load %arg13[%c0_27, %c0_28] : memref<16x64xf32, #tpu.memory_space<vmem>>, vector<16x64xf32>
    %cst_29 = arith.constant dense<0.000000e+00> : vector<8x64xf32>
    %42 = tpu.matmul %16, %41, %cst_29 {dimension_numbers = #tpu.dot_dimension_numbers<[1], [0], [0], [1], [0, 0, 1, 1], [], []>} : vector<8x16xf32>, vector<16x64xf32>, vector<8x64xf32> -> vector<8x64xf32>
    %43 = arith.addf %40, %42 : vector<8x64xf32>
    %c0_30 = arith.constant 0 : index
    %c0_31 = arith.constant 0 : index
    %44 = vector.load %arg14[%c0_30, %c0_31] : memref<16x64xf32, #tpu.memory_space<vmem>>, vector<16x64xf32>
    %cst_32 = arith.constant dense<0.000000e+00> : vector<8x64xf32>
    %45 = tpu.matmul %38, %44, %cst_32 {dimension_numbers = #tpu.dot_dimension_numbers<[1], [0], [0], [1], [0, 0, 1, 1], [], []>} : vector<8x16xf32>, vector<16x64xf32>, vector<8x64xf32> -> vector<8x64xf32>
    %46 = arith.addf %43, %45 : vector<8x64xf32>
    %c0_33 = arith.constant 0 : index
    %c0_34 = arith.constant 0 : index
    %47 = vector.load %arg15[%c0_33, %c0_34] : memref<1x64xf32, #tpu.memory_space<vmem>>, vector<1x64xf32>
    %48 = vector.broadcast %47 : vector<1x64xf32> to vector<8x64xf32>
    %49 = arith.addf %46, %48 : vector<8x64xf32>
    %cst_35 = arith.constant 0.000000e+00 : f32
    %50 = vector.broadcast %cst_35 : f32 to vector<8x64xf32>
    %51 = arith.maximumf %49, %50 : vector<8x64xf32>
    %c0_36 = arith.constant 0 : index
    %c0_37 = arith.constant 0 : index
    %52 = vector.load %arg16[%c0_36, %c0_37] : memref<64x64xf32, #tpu.memory_space<vmem>>, vector<64x64xf32>
    %cst_38 = arith.constant dense<0.000000e+00> : vector<8x64xf32>
    %53 = tpu.matmul %51, %52, %cst_38 {dimension_numbers = #tpu.dot_dimension_numbers<[1], [0], [0], [1], [0, 0, 1, 1], [], []>} : vector<8x64xf32>, vector<64x64xf32>, vector<8x64xf32> -> vector<8x64xf32>
    %c0_39 = arith.constant 0 : index
    %c0_40 = arith.constant 0 : index
    %54 = vector.load %arg17[%c0_39, %c0_40] : memref<1x64xf32, #tpu.memory_space<vmem>>, vector<1x64xf32>
    %55 = vector.broadcast %54 : vector<1x64xf32> to vector<8x64xf32>
    %56 = arith.addf %53, %55 : vector<8x64xf32>
    %cst_41 = arith.constant 0.000000e+00 : f32
    %57 = vector.broadcast %cst_41 : f32 to vector<8x64xf32>
    %58 = arith.maximumf %56, %57 : vector<8x64xf32>
    %c0_42 = arith.constant 0 : index
    %c0_43 = arith.constant 0 : index
    %59 = vector.load %arg18[%c0_42, %c0_43] : memref<64x1xf32, #tpu.memory_space<vmem>>, vector<64x1xf32>
    %cst_44 = arith.constant dense<0.000000e+00> : vector<8x1xf32>
    %60 = tpu.matmul %58, %59, %cst_44 {dimension_numbers = #tpu.dot_dimension_numbers<[1], [0], [0], [1], [0, 0, 1, 1], [], []>} : vector<8x64xf32>, vector<64x1xf32>, vector<8x1xf32> -> vector<8x1xf32>
    %c0_45 = arith.constant 0 : index
    %c0_46 = arith.constant 0 : index
    %61 = vector.load %arg19[%c0_45, %c0_46] : memref<1x1xf32, #tpu.memory_space<vmem>>, vector<1x1xf32>
    %62 = vector.broadcast %61 : vector<1x1xf32> to vector<8x1xf32>
    %63 = arith.addf %60, %62 : vector<8x1xf32>
    %c0_47 = arith.constant 0 : index
    %c0_48 = arith.constant 0 : index
    %64 = vector.load %arg20[%c0_47, %c0_48] : memref<8x1xf32, #tpu.memory_space<vmem>>, vector<8x1xf32>
    tpu.vector_store %arg20[%c0_47, %c0_48], %63 {strides = array<i32>} : memref<8x1xf32, #tpu.memory_space<vmem>>, vector<8x1xf32>,
    return
  }
  func.func @transform_0(%arg0: i32) -> (i32, i32) {
    %c0_i32 = arith.constant 0 : i32
    %c0_i32_0 = arith.constant 0 : i32
    return %arg0, %c0_i32 : i32, i32
  }
  func.func @transform_1(%arg0: i32) -> (i32, i32) {
    %c0_i32 = arith.constant 0 : i32
    %c0_i32_0 = arith.constant 0 : i32
    return %arg0, %c0_i32 : i32, i32
  }
  func.func @transform_2(%arg0: i32) -> (i32, i32) {
    %c0_i32 = arith.constant 0 : i32
    %c0_i32_0 = arith.constant 0 : i32
    return %arg0, %c0_i32 : i32, i32
  }
  func.func @transform_3(%arg0: i32) -> (i32, i32) {
    %c0_i32 = arith.constant 0 : i32
    %c0_i32_0 = arith.constant 0 : i32
    %c0_i32_1 = arith.constant 0 : i32
    return %c0_i32, %c0_i32_0 : i32, i32
  }
  func.func @transform_4(%arg0: i32) -> (i32, i32) {
    %c0_i32 = arith.constant 0 : i32
    %c0_i32_0 = arith.constant 0 : i32
    %c0_i32_1 = arith.constant 0 : i32
    return %c0_i32, %c0_i32_0 : i32, i32
  }
  func.func @transform_5(%arg0: i32) -> (i32, i32) {
    %c0_i32 = arith.constant 0 : i32
    %c0_i32_0 = arith.constant 0 : i32
    %c0_i32_1 = arith.constant 0 : i32
    return %c0_i32, %c0_i32_0 : i32, i32
  }
  func.func @transform_6(%arg0: i32) -> (i32, i32) {
    %c0_i32 = arith.constant 0 : i32
    %c0_i32_0 = arith.constant 0 : i32
    %c0_i32_1 = arith.constant 0 : i32
    return %c0_i32, %c0_i32_0 : i32, i32
  }
  func.func @transform_7(%arg0: i32) -> (i32, i32) {
    %c0_i32 = arith.constant 0 : i32
    %c0_i32_0 = arith.constant 0 : i32
    %c0_i32_1 = arith.constant 0 : i32
    return %c0_i32, %c0_i32_0 : i32, i32
  }
  func.func @transform_8(%arg0: i32) -> (i32, i32) {
    %c0_i32 = arith.constant 0 : i32
    %c0_i32_0 = arith.constant 0 : i32
    %c0_i32_1 = arith.constant 0 : i32
    return %c0_i32, %c0_i32_0 : i32, i32
  }
  func.func @transform_9(%arg0: i32) -> (i32, i32) {
    %c0_i32 = arith.constant 0 : i32
    %c0_i32_0 = arith.constant 0 : i32
    %c0_i32_1 = arith.constant 0 : i32
    return %c0_i32, %c0_i32_0 : i32, i32
  }
  func.func @transform_10(%arg0: i32) -> (i32, i32) {
    %c0_i32 = arith.constant 0 : i32
    %c0_i32_0 = arith.constant 0 : i32
    %c0_i32_1 = arith.constant 0 : i32
    return %c0_i32, %c0_i32_0 : i32, i32
  }
  func.func @transform_11(%arg0: i32) -> (i32, i32) {
    %c0_i32 = arith.constant 0 : i32
    %c0_i32_0 = arith.constant 0 : i32
    %c0_i32_1 = arith.constant 0 : i32
    return %c0_i32, %c0_i32_0 : i32, i32
  }
  func.func @transform_12(%arg0: i32) -> (i32, i32) {
    %c0_i32 = arith.constant 0 : i32
    %c0_i32_0 = arith.constant 0 : i32
    %c0_i32_1 = arith.constant 0 : i32
    return %c0_i32, %c0_i32_0 : i32, i32
  }
  func.func @transform_13(%arg0: i32) -> (i32, i32) {
    %c0_i32 = arith.constant 0 : i32
    %c0_i32_0 = arith.constant 0 : i32
    %c0_i32_1 = arith.constant 0 : i32
    return %c0_i32, %c0_i32_0 : i32, i32
  }
  func.func @transform_14(%arg0: i32) -> (i32, i32) {
    %c0_i32 = arith.constant 0 : i32
    %c0_i32_0 = arith.constant 0 : i32
    %c0_i32_1 = arith.constant 0 : i32
    return %c0_i32, %c0_i32_0 : i32, i32
  }
  func.func @transform_15(%arg0: i32) -> (i32, i32) {
    %c0_i32 = arith.constant 0 : i32
    %c0_i32_0 = arith.constant 0 : i32
    %c0_i32_1 = arith.constant 0 : i32
    return %c0_i32, %c0_i32_0 : i32, i32
  }
  func.func @transform_16(%arg0: i32) -> (i32, i32) {
    %c0_i32 = arith.constant 0 : i32
    %c0_i32_0 = arith.constant 0 : i32
    %c0_i32_1 = arith.constant 0 : i32
    return %c0_i32, %c0_i32_0 : i32, i32
  }
  func.func @transform_17(%arg0: i32) -> (i32, i32) {
    %c0_i32 = arith.constant 0 : i32
    %c0_i32_0 = arith.constant 0 : i32
    %c0_i32_1 = arith.constant 0 : i32
    return %c0_i32, %c0_i32_0 : i32, i32
  }
  func.func @transform_18(%arg0: i32) -> (i32, i32) {
    %c0_i32 = arith.constant 0 : i32
    %c0_i32_0 = arith.constant 0 : i32
    %c0_i32_1 = arith.constant 0 : i32
    return %c0_i32, %c0_i32_0 : i32, i32
  }
  func.func @transform_19(%arg0: i32) -> (i32, i32) {
    %c0_i32 = arith.constant 0 : i32
    %c0_i32_0 = arith.constant 0 : i32
    return %arg0, %c0_i32 : i32, i32
  }
}

</mosaic_0001>

<bundles_post_ra>
// kernel: tpu_custom_call.1
= control target key start
LH: loop header
LB: loop body
LE: loop exit
PB: predicated region body
PF: predicated region fallthrough
CT: control target
= control target key end

     0   :  { %v352_v0 = vmov 0   ;;  %v353_v2 = vmov 1   ;;  %vm88_vm0 = vcmask 64512   ;;  %vm179_vm1 = vcmask 130048   ;;  %s611_s1 = inlined_call_operand.vmem [shape: f32[8,1], index: 1, kind: input, shape index: {}]   ;;  %s612_s2 = inlined_call_operand.vmem [shape: f32[8,2], index: 2, kind: input, shape index: {}]   ;;  %s613_s3 = inlined_call_operand.vmem [shape: f32[1,8], index: 3, kind: input, shape index: {}]   ;;  %s614_s4 = inlined_call_operand.vmem [shape: f32[1,8], index: 4, kind: input, shape index: {}]   ;;  %s615_s8 = inlined_call_operand.vmem [shape: f32[1,8], index: 8, kind: input, shape index: {}]   ;;  %s616_s6 = inlined_call_operand.vmem [shape: f32[1,16], index: 6, kind: input, shape index: {}]   ;;  %s617_s5 = inlined_call_operand.vmem [shape: f32[8,16], index: 5, kind: input, shape index: {}]   ;;  %s618_s9 = inlined_call_operand.vmem [shape: f32[8,16], index: 9, kind: input, shape index: {}]   ;;  %s619_s11 = inlined_call_operand.vmem [shape: f32[128,64], index: 11, kind: input, shape index: {}]   ;;  %s620_s7 = inlined_call_operand.vmem [shape: f32[2,8], index: 7, kind: input, shape index: {}]   ;;  %s621_s10 = inlined_call_operand.vmem [shape: f32[1,16], index: 10, kind: input, shape index: {}]   ;;  %s622_s12 = inlined_call_operand.vmem [shape: f32[16,64], index: 12, kind: input, shape index: {}]   ;;  %s623_s0 = inlined_call_operand.vmem [shape: f32[8,128], index: 0, kind: input, shape index: {}]   ;;  %s624_s13 = inlined_call_operand.vmem [shape: f32[16,64], index: 13, kind: input, shape index: {}]   ;;  %s625_s15 = inlined_call_operand.vmem [shape: f32[64,64], index: 15, kind: input, shape index: {}]   ;;  %s626_s14 = inlined_call_operand.vmem [shape: f32[1,64], index: 14, kind: input, shape index: {}]   ;;  %s627_s16 = inlined_call_operand.vmem [shape: f32[1,64], index: 16, kind: input, shape index: {}]   ;;  %s628_s17 = inlined_call_operand.vmem [shape: f32[64,1], index: 17, kind: input, shape index: {}]   ;;  %s629_s18 = inlined_call_operand.<no memory space> [shape: f32[1,1], index: 18, kind: input, shape index: {}]   ;;  %s630_s19 = inlined_call_operand.vmem [shape: f32[8,1], index: 19, kind: output, shape index: {}]  }
   0x1   :  { %631 = sst [smem:[#allocation3_spill]] %s611_s1  ;;  %341 = vset.pattern.permute.xlu0 %v352_v0  ;;  %342 = vset.pattern.permute.xlu1 %v353_v2  ;;  %v83_v4 = vld [vmem:[%s617_s5] sm:$0xff]  ;;  %v176_v6 = vld [vmem:[%s619_s11 + $0x78] sm:$0xff]  ;;  %v175_v7 = vld [vmem:[%s619_s11 + $0x70] sm:$0xff]  ;;  %vm267_vm2 = vcmask 523264   ;;  %vm327_vm3 = vcmask 7168  }
   0x2   :  { %632 = sst [smem:[#allocation4_spill]] %s612_s2  ;;  %107 = vmatpush.msra.mxu0 %v83_v4  ;;  %v133_v5 = vld [vmem:[%s618_s9] sm:$0xff]  ;;  %203 = vmatpush.msra.mxu3 %v176_v6  ;;  %v174_v8 = vld [vmem:[%s619_s11 + $0x68] sm:$0xff]  ;;  %v172_v10 = vld [vmem:[%s619_s11 + $0x58] sm:$0xff] }
   0x3   :  { %633 = sst [smem:[#allocation5_spill]] %s613_s3  ;;  %156 = vmatpush.msra.mxu1 %v133_v5  ;;  %v173_v9 = vld [vmem:[%s619_s11 + $0x60] sm:$0xff]  ;;  %v171_v11 = vld [vmem:[%s619_s11 + $0x50] sm:$0xff]  ;;  %v170_v12 = vld [vmem:[%s619_s11 + $0x48] sm:$0xff] }
   0x4   :  { %634 = sst [smem:[#allocation6_spill]] %s614_s4  ;;  %204 = vmatpush.msra.mxu3 %v175_v7  ;;  %v169_v14 = vld [vmem:[%s619_s11 + $0x40] sm:$0xff]  ;;  %v168_v16 = vld [vmem:[%s619_s11 + $0x38] sm:$0xff]  ;;  %v167_v20 = vld [vmem:[%s619_s11 + $0x30] sm:$0xff] }
   0x5   :  { %s635_s20 = sld [smem:[#allocation3_spill]]  ;;  %v112_v18 = vld [vmem:[%s620_s7] sm:$0x3]  ;;  %v166_v23 = vld [vmem:[%s619_s11 + $0x28] sm:$0xff]  ;;  %v164_v29 = vld [vmem:[%s619_s11 + $0x18] sm:$0xff] }
   0x6   :  { %s636_s22 = sld [smem:[#allocation4_spill]]  ;;  %205 = vmatpush.msra.mxu3 %v174_v8  ;;  %v124_v22 = vperm.slane %v112_v18, 1  ;;  %v118_v26 = vperm.slane %v112_v18, 0  ;;  %v165_v27 = vld [vmem:[%s619_s11 + $0x20] sm:$0xff]  ;;  %v163_v33 = vld [vmem:[%s619_s11 + $0x10] sm:$0xff]  ;;  %v178_v37 = vld [vmem:[%s622_s12 + $0x8] sm:$0xff] }
   0x7   :  { %s637_s25 = sld [smem:[#allocation5_spill]]  ;;  %v346_v32 = vld [vmem:[%s615_s8] ss:$0 sm:$0xff]  ;;  %v162_v38 = vld [vmem:[%s619_s11 + $0x8] sm:$0xff]  ;;  %197 = vmatpush.msra.mxu2 %v178_v37  ;;  %v262_v44 = vld [vmem:[%s625_s15 + $0x38] sm:$0xff] }
   0x8   :  { %206 = vmatpush.msra.mxu3 %v173_v9  ;;  %s638_s29 = sld [smem:[#allocation6_spill]]  ;;  %v177_v39 = vld [vmem:[%s622_s12] sm:$0xff]  ;;  %v224_v42 = vld [vmem:[%s624_s13 + $0x8] sm:$0xff]  ;;  %v261_v45 = vld [vmem:[%s625_s15 + $0x30] sm:$0xff]  ;;  %279 = vmatpush.msrb.mxu1 %v262_v44 }
   0x9   :  { %v161_v40 = vld [vmem:[%s619_s11] sm:$0xff]  ;;  %198 = vmatpush.msra.mxu2 %v177_v39  ;;  %242 = vmatpush.msrb.mxu0 %v224_v42  ;;  %v260_v52 = vld [vmem:[%s625_s15 + $0x28] sm:$0xff]  ;;  %v258_v54 = vld [vmem:[%s625_s15 + $0x18] sm:$0xff] }
   0xa   :  { %207 = vmatpush.msra.mxu3 %v172_v10  ;;  %v64_v41 = vld [vmem:[%s623_s0] sm:$0xff]  ;;  %280 = vmatpush.msrb.mxu1 %v261_v45  ;;  %v257_v55 = vld [vmem:[%s625_s15 + $0x10] sm:$0xff]  ;;  %v256_v56 = vld [vmem:[%s625_s15 + $0x8] sm:$0xff]  ;;  %v24_v10 = vstv %s629_s18 }
   0xb   :  { %v65_v1 = vld [vmem:[%s635_s20] sm:$0xff]  ;;  %v299_v58 = vld [vmem:[%s628_s17 + $0x38] sm:$0xff]  ;;  %v298_v59 = vld [vmem:[%s628_s17 + $0x30] sm:$0xff]  ;;  %25 = vst [vmem:[#allocation2] sm:$0x1] %v24_v10 }
   0xc   :  { %v66_v3 = vld [vmem:[%s636_s22] sm:$0xff]  ;;  %70 = vperm.xlu0 %341, %v65_v1   ;;  %208 = vmatpush.msra.mxu3 %v171_v11  ;;  %v297_v60 = vld [vmem:[%s628_s17 + $0x28] sm:$0xff]  ;;  %v295_v62 = vld [vmem:[%s628_s17 + $0x18] sm:$0xff] }
   0xd   :  { %121 = vperm.xlu1 %342, %v66_v3   ;;  %v344_v13 = vld [vmem:[%s637_s25] ss:$0 sm:$0xff]  ;;  %281 = vmatpush.msrb.mxu1 %v260_v52  ;;  %v294_v7 = vld [vmem:[%s628_s17 + $0x10] sm:$0xff]  ;;  %v293_v8 = vld [vmem:[%s628_s17 + $0x8] sm:$0xff] }
   0xe   :  { %209 = vmatpush.msra.mxu3 %v170_v12  ;;  %v345_v15 = vld [vmem:[%s638_s29] ss:$0 sm:$0xff]  ;;  %315 = vmatpush.msrb.mxu2 %v299_v58 }
   0xf   :  { %v223_v43 = vld [vmem:[%s624_s13] sm:$0xff] }
  0x10   :  { %210 = vmatpush.msra.mxu3 %v169_v14  ;;  %243 = vmatpush.msrb.mxu0 %v223_v43  ;;  %v347_v46 = vld [vmem:[%s616_s6] ss:$0 sm:$0xff] }
  0x11   :  { %v348_v49 = vld [vmem:[%s621_s10] ss:$0 sm:$0xff]  ;;  %316 = vmatpush.msrb.mxu2 %v298_v59 }
  0x12   :  { %211 = vmatpush.msra.mxu3 %v168_v16  ;;  %v259_v53 = vld [vmem:[%s625_s15 + $0x20] sm:$0xff] }
  0x13   :  { %282 = vmatpush.msrb.mxu1 %v259_v53  ;;  %v255_v57 = vld [vmem:[%s625_s15] sm:$0xff]  ;;  %317 = vmatpush.msrb.mxu2 %v297_v60 }
  0x14   :  { %115 = vperm.xlu0 %341, %v66_v3   ;;  %212 = vmatpush.msra.mxu3 %v167_v20  ;;  %v296_v61 = vld [vmem:[%s628_s17 + $0x20] sm:$0xff] }
  0x15   :  { %283 = vmatpush.msrb.mxu1 %v258_v54  ;;  %318 = vmatpush.msrb.mxu2 %v296_v61  ;;  %v292_v9 = vld [vmem:[%s628_s17] sm:$0xff] }
  0x16   :  { %213 = vmatpush.msra.mxu3 %v166_v23  ;;  %v350_v11 = vld [vmem:[%s627_s16] ss:$0 sm:$0xff] }
  0x17   :  { %284 = vmatpush.msrb.mxu1 %v257_v55  ;;  %319 = vmatpush.msrb.mxu2 %v295_v62 }
  0x18   :  { %214 = vmatpush.msra.mxu3 %v165_v27 }
  0x19   :  { %285 = vmatpush.msrb.mxu1 %v256_v56  ;;  %320 = vmatpush.msrb.mxu2 %v294_v7 }
  0x1a   :  { %215 = vmatpush.msra.mxu3 %v164_v29 }
  0x1b   :  { %286 = vmatpush.msrb.mxu1 %v255_v57  ;;  %321 = vmatpush.msrb.mxu2 %v293_v8 }
  0x1c   :  { %343 = vset.pattern.permute.xlu0 %v353_v2  ;;  %216 = vmatpush.msra.mxu3 %v163_v33  ;;  %v349_v2 = vld [vmem:[%s626_s14] ss:$0 sm:$0xff] }
  0x1d   :  { %322 = vmatpush.msrb.mxu2 %v292_v9 }
  0x1e   :  { %217 = vmatpush.msra.mxu3 %v162_v38 }
  0x20   :  { %218 = vmatpush.msra.mxu3 %v161_v40 }
  0x21   :  { %219 = vmatmul.f32.vlgmr.msra.gmra.mxu3 %v64_v41 }
  0x7e   :  { %v71_v17 = vpop.permute.xlu0 %70 }
  0x7f   :  { %v76_v19 = vmul.f32 %v344_v13, %v71_v17  ;;  %v122_v24 = vpop.permute.xlu1 %121 }
  0x80   :  { %v125_v28 = vmul.f32 %v124_v22, %v122_v24 }
  0x81   :  { %v81_v21 = vadd.f32 %v345_v15, %v76_v19  ;;  %v351_v15 = vld [vmem:[#allocation2] ss:$0 sm:$0xff] }
  0x83   :  { %v82_v25 = vmax.f32 %v81_v21, 0.0 }
  0x85   :  { %333 = vmatmul.msk.f32.vlgmr.msra.gmra.mxu0 %vm88_vm0, %v82_v25 }
  0x86   :  { %v116_v30 = vpop.permute.xlu0 %115 }
  0x87   :  { %v119_v31 = vmul.f32 %v118_v26, %v116_v30 }
  0x89   :  { %v126_v34 = vadd.f32 %v125_v28, %v119_v31 }
  0x8b   :  { %v131_v35 = vadd.f32 %v346_v32, %v126_v34 }
  0x8d   :  { %v132_v36 = vmax.f32 %v131_v35, 0.0 }
  0x8f   :  { %334 = vmatmul.msk.f32.vlgmr.msra.gmra.mxu1 %vm88_vm0, %v132_v36 }
  0xa4   :  { %v220_v0 = vpop.f32.mrf.mxu3 }
 0x102   :  { %v109_v47 = vpop.f32.mrf.mxu0 }
 0x103   :  { %v110_v48 = vadd.f32 %v347_v46, %v109_v47 }
 0x105   :  { %335 = vmatmul.msk.f32.vlgmr.msra.gmra.mxu2 %vm179_vm1, %v110_v48 }
 0x10c   :  { %v158_v50 = vpop.f32.mrf.mxu1 }
 0x10d   :  { %v159_v51 = vadd.f32 %v348_v49, %v158_v50 }
 0x10f   :  { %336 = vmatmul.msk.f32.vlgmr.msrb.gmra.mxu0 %vm179_vm1, %v159_v51 }
 0x188   :  { %v200_v63 = vpop.f32.mrf.mxu2 }
 0x189   :  { %v221_v1 = vadd.f32 %v220_v0, %v200_v63 }
 0x18c   :  { %v245_v3 = vpop.f32.mrf.mxu0 }
 0x18d   :  { %v248_v4 = vadd.f32 %v245_v3, %v221_v1 }
 0x18f   :  { %v253_v5 = vadd.f32 %v349_v2, %v248_v4 }
 0x191   :  { %v254_v6 = vmax.f32 %v253_v5, 0.0 }
 0x193   :  { %337 = vmatmul.msk.f32.vlgmr.msrb.gmra.mxu1 %vm267_vm2, %v254_v6 }
 0x210   :  { %v288_v12 = vpop.f32.mrf.mxu1 }
 0x211   :  { %v289_v13 = vadd.f32 %v350_v11, %v288_v12 }
 0x213   :  { %v291_v14 = vmax.f32 %v289_v13, 0.0 }
 0x215   :  { %338 = vmatmul.msk.f32.vlgmr.msrb.gmra.mxu2 %vm267_vm2, %v291_v14 }
 0x298   :  { %v324_v16 = vpop.f32.mrf.mxu2 }
 0x299   :  { %v325_v17 = vadd.f32 %v351_v15, %v324_v16 }
 0x29b   :  { %328 = vst.msk [vmem:[%s630_s19] sm:$0xff] %vm327_vm3, %v325_v17 }

</bundles_post_ra>
